<compile_context>
chip_gen: v6e
topology: v6e:2x2x1
jax: 0.10.0
libtpu: 0.0.40
codegen_flags: <defaults>
</compile_context>

<pallas_src>
import functools

import jax
import jax.numpy as jnp
from jax.experimental import pallas as pl
from jax.experimental.pallas import tpu as pltpu

NUM_CANDIDATES = 6
CTRL_DIM = 10 * 3  # 10 control points x 3 coords


def _path_optimizer_kernel(
    state_ref,            # (B, L)
    noise_ref,            # (C*B, 30)  pre-scaled noise, candidate-major rows (c*B + b)
    w1_ref, b1_ref,       # (L, L), (1, L)        path_generator layer 0
    w2_ref, b2_ref,       # (L, 30), (1, 30)      path_generator layer 2
    w3a_ref, w3b_ref, b3_ref,  # (L, L), (30, L), (1, L)   optimizer layer 0 (split)
    w4_ref, b4_ref,       # (L, L), (1, L)        optimizer layer 2
    w5_ref, b5_ref,       # (L, H*3), (1, H*3)    optimizer layer 4
    paths_ref,            # out: (C*B, H*3)
):
    f32 = jnp.float32
    state = state_ref[...]          # (B, L)
    noise = noise_ref[...]          # (C*B, 30)

    # --- shared path generator: Linear -> ReLU -> Linear -------------------
    h = jnp.dot(state, w1_ref[...], preferred_element_type=f32) + b1_ref[...]
    h = jnp.maximum(h, 0.0)
    cp = jnp.dot(h, w2_ref[...], preferred_element_type=f32) + b2_ref[...]   # (B, 30)

    # --- candidate-invariant part of optimizer layer 0 ----------------------
    # [state, cp + noise_c] @ w3 + b3 == (state@w3a + cp@w3b + b3) + noise_c@w3b
    base = (
        jnp.dot(state, w3a_ref[...], preferred_element_type=f32)
        + jnp.dot(cp, w3b_ref[...], preferred_element_type=f32)
        + b3_ref[...]
    )                                                        # (B, L)
    base_all = jnp.concatenate([base] * NUM_CANDIDATES, axis=0)   # (C*B, L)

    # --- all candidates at once: 3 batched MXU matmuls ---------------------
    h1 = jnp.maximum(
        base_all + jnp.dot(noise, w3b_ref[...], preferred_element_type=f32), 0.0
    )                                                        # (C*B, L)
    h2 = jnp.maximum(
        jnp.dot(h1, w4_ref[...], preferred_element_type=f32) + b4_ref[...], 0.0
    )                                                        # (C*B, L)
    paths_ref[...] = (
        jnp.dot(h2, w5_ref[...], preferred_element_type=f32) + b5_ref[...]
    )                                                        # (C*B, H*3), one dense store


def differentiable_path_optimizer(
    state_encoding, cost_volume, route_features, params, *, horizon, key
):
    """JAX wrapper reproducing DifferentiablePathOptimizer.forward semantics."""
    del route_features  # unused in the reference forward
    batch = state_encoding.shape[0]
    latent_dim = state_encoding.shape[1]
    assert cost_volume.shape[0] == batch  # cost_volume only supplies batch size

    k_noise, k_cost = jax.random.split(key)
    # torch.randn_like(control_points) * 0.1*(i+1), flattened candidate-major
    scales = 0.1 * jnp.arange(1, NUM_CANDIDATES + 1, dtype=jnp.float32)
    noise = jax.random.normal(
        k_noise, (NUM_CANDIDATES, batch, CTRL_DIM), dtype=jnp.float32
    )
    noise = (noise * scales[:, None, None]).reshape(NUM_CANDIDATES * batch, CTRL_DIM)
    # placeholder for sample_cost_along_path -> torch.rand(batch, horizon) per candidate
    path_cost = jax.random.uniform(
        k_cost, (batch, NUM_CANDIDATES, horizon), dtype=jnp.float32
    )

    # split optimizer layer-0 weight so the kernel never concatenates on lanes
    w3 = params["w3"]
    w3a = w3[:latent_dim, :]     # (L, L)
    w3b = w3[latent_dim:, :]     # (30, L)

    vmem = pl.BlockSpec(memory_space=pltpu.MemorySpace.VMEM)
    n_inputs = 13  # state, noise, 5x(W,b) with w3 split into (w3a, w3b, b3)

    paths_flat = pl.pallas_call(
        _path_optimizer_kernel,
        out_shape=jax.ShapeDtypeStruct(
            (NUM_CANDIDATES * batch, horizon * 3), jnp.float32
        ),
        in_specs=[vmem] * n_inputs,
        out_specs=vmem,
    )(
        state_encoding,
        noise,
        params["w1"], params["b1"],
        params["w2"], params["b2"],
        w3a, w3b, params["b3"],
        params["w4"], params["b4"],
        params["w5"], params["b5"],
    )

    # (C*B, H*3) -> (C, B, H, 3) -> (B, C, H, 3)  (row-major, matches torch .view)
    paths = paths_flat.reshape(NUM_CANDIDATES, batch, horizon, 3).transpose(1, 0, 2, 3)

    # path_features = [state, path[:,0], path[:,-1], path_cost] -- pure data
    # movement, assembled in plain JAX (per perf review).
    state_b = jnp.broadcast_to(
        state_encoding[:, None, :], (batch, NUM_CANDIDATES, latent_dim)
    )
    first_pt = paths[:, :, 0, :]   # (B, C, 3)
    last_pt = paths[:, :, -1, :]   # (B, C, 3)
    path_features = jnp.concatenate([state_b, first_pt, last_pt, path_cost], axis=-1)
    return paths, path_features


def init_params(latent_dim, horizon, key):
    """Deterministic synthetic weights (stored as (in, out), i.e. W = W_torch.T)."""
    ks = jax.random.split(key, 10)

    def lin(kw, kb, fan_in, fan_out):
        scale = 1.0 / jnp.sqrt(jnp.float32(fan_in))
        w = jax.random.normal(kw, (fan_in, fan_out), dtype=jnp.float32) * scale
        b = jax.random.normal(kb, (1, fan_out), dtype=jnp.float32) * 0.01
        return w, b

    w1, b1 = lin(ks[0], ks[1], latent_dim, latent_dim)
    w2, b2 = lin(ks[2], ks[3], latent_dim, CTRL_DIM)
    w3, b3 = lin(ks[4], ks[5], latent_dim + CTRL_DIM, latent_dim)
    w4, b4 = lin(ks[6], ks[7], latent_dim, latent_dim)
    w5, b5 = lin(ks[8], ks[9], latent_dim, horizon * 3)
    return dict(w1=w1, b1=b1, w2=w2, b2=b2, w3=w3, b3=b3,
                w4=w4, b4=b4, w5=w5, b5=b5)


if __name__ == "__main__":
    batch = 2
    latent_dim = 32
    horizon = 8

    root = jax.random.PRNGKey(0)
    k_params, k_state, k_cost_vol, k_route, k_fwd = jax.random.split(root, 5)

    params = init_params(latent_dim, horizon, k_params)

    # inputs (cost_volume kept NCHW-like as the PyTorch module expects; only
    # its batch dim is used by the forward)
    state_encoding = jax.random.normal(k_state, (batch, latent_dim), dtype=jnp.float32)
    cost_volume = jax.random.normal(k_cost_vol, (batch, 1, 16, 16), dtype=jnp.float32)
    route_features = jax.random.normal(k_route, (batch, 16), dtype=jnp.float32)

    fwd = jax.jit(
        functools.partial(differentiable_path_optimizer, horizon=horizon, key=k_fwd)
    )
    paths, path_features = fwd(state_encoding, cost_volume, route_features, params)
    jax.block_until_ready((paths, path_features))

    assert paths.shape == (batch, NUM_CANDIDATES, horizon, 3), paths.shape
    assert path_features.shape == (
        batch, NUM_CANDIDATES, latent_dim + 3 + 3 + horizon
    ), path_features.shape
    assert bool(jnp.all(jnp.isfinite(paths)))
    assert bool(jnp.all(jnp.isfinite(path_features)))

    print("KERNEL_OK")
</pallas_src>

<mosaic_0001>
module attributes {stable_mosaic.version = 11 : i64} {
  func.func @_path_optimizer_kernel(%arg0: memref<2x32xf32, #tpu.memory_space<vmem>>, %arg1: memref<12x30xf32, #tpu.memory_space<vmem>>, %arg2: memref<32x32xf32, #tpu.memory_space<vmem>>, %arg3: memref<1x32xf32, #tpu.memory_space<vmem>>, %arg4: memref<32x30xf32, #tpu.memory_space<vmem>>, %arg5: memref<1x30xf32, #tpu.memory_space<vmem>>, %arg6: memref<32x32xf32, #tpu.memory_space<vmem>>, %arg7: memref<30x32xf32, #tpu.memory_space<vmem>>, %arg8: memref<1x32xf32, #tpu.memory_space<vmem>>, %arg9: memref<32x32xf32, #tpu.memory_space<vmem>>, %arg10: memref<1x32xf32, #tpu.memory_space<vmem>>, %arg11: memref<32x24xf32, #tpu.memory_space<vmem>>, %arg12: memref<1x24xf32, #tpu.memory_space<vmem>>, %arg13: memref<12x24xf32, #tpu.memory_space<vmem>>) attributes {dimension_semantics = [], scalar_prefetch = 0 : i64, scratch_operands = 0 : i64, tpu.core_type = #tpu.core_type<tc>} {
    %c0 = arith.constant 0 : index
    %c0_0 = arith.constant 0 : index
    %0 = vector.load %arg0[%c0, %c0_0] : memref<2x32xf32, #tpu.memory_space<vmem>>, vector<2x32xf32>
    %c0_1 = arith.constant 0 : index
    %c0_2 = arith.constant 0 : index
    %1 = vector.load %arg1[%c0_1, %c0_2] : memref<12x30xf32, #tpu.memory_space<vmem>>, vector<12x30xf32>
    %c0_3 = arith.constant 0 : index
    %c0_4 = arith.constant 0 : index
    %2 = vector.load %arg2[%c0_3, %c0_4] : memref<32x32xf32, #tpu.memory_space<vmem>>, vector<32x32xf32>
    %cst = arith.constant dense<0.000000e+00> : vector<2x32xf32>
    %3 = tpu.matmul %0, %2, %cst {dimension_numbers = #tpu.dot_dimension_numbers<[1], [0], [0], [1], [0, 0, 1, 1], [], []>} : vector<2x32xf32>, vector<32x32xf32>, vector<2x32xf32> -> vector<2x32xf32>
    %c0_5 = arith.constant 0 : index
    %c0_6 = arith.constant 0 : index
    %4 = vector.load %arg3[%c0_5, %c0_6] : memref<1x32xf32, #tpu.memory_space<vmem>>, vector<1x32xf32>
    %5 = vector.broadcast %4 : vector<1x32xf32> to vector<2x32xf32>
    %6 = arith.addf %3, %5 : vector<2x32xf32>
    %cst_7 = arith.constant 0.000000e+00 : f32
    %7 = vector.broadcast %cst_7 : f32 to vector<2x32xf32>
    %8 = arith.maximumf %6, %7 : vector<2x32xf32>
    %c0_8 = arith.constant 0 : index
    %c0_9 = arith.constant 0 : index
    %9 = vector.load %arg4[%c0_8, %c0_9] : memref<32x30xf32, #tpu.memory_space<vmem>>, vector<32x30xf32>
    %cst_10 = arith.constant dense<0.000000e+00> : vector<2x30xf32>
    %10 = tpu.matmul %8, %9, %cst_10 {dimension_numbers = #tpu.dot_dimension_numbers<[1], [0], [0], [1], [0, 0, 1, 1], [], []>} : vector<2x32xf32>, vector<32x30xf32>, vector<2x30xf32> -> vector<2x30xf32>
    %c0_11 = arith.constant 0 : index
    %c0_12 = arith.constant 0 : index
    %11 = vector.load %arg5[%c0_11, %c0_12] : memref<1x30xf32, #tpu.memory_space<vmem>>, vector<1x30xf32>
    %12 = vector.broadcast %11 : vector<1x30xf32> to vector<2x30xf32>
    %13 = arith.addf %10, %12 : vector<2x30xf32>
    %c0_13 = arith.constant 0 : index
    %c0_14 = arith.constant 0 : index
    %14 = vector.load %arg6[%c0_13, %c0_14] : memref<32x32xf32, #tpu.memory_space<vmem>>, vector<32x32xf32>
    %cst_15 = arith.constant dense<0.000000e+00> : vector<2x32xf32>
    %15 = tpu.matmul %0, %14, %cst_15 {dimension_numbers = #tpu.dot_dimension_numbers<[1], [0], [0], [1], [0, 0, 1, 1], [], []>} : vector<2x32xf32>, vector<32x32xf32>, vector<2x32xf32> -> vector<2x32xf32>
    %c0_16 = arith.constant 0 : index
    %c0_17 = arith.constant 0 : index
    %16 = vector.load %arg7[%c0_16, %c0_17] : memref<30x32xf32, #tpu.memory_space<vmem>>, vector<30x32xf32>
    %cst_18 = arith.constant dense<0.000000e+00> : vector<2x32xf32>
    %17 = tpu.matmul %13, %16, %cst_18 {dimension_numbers = #tpu.dot_dimension_numbers<[1], [0], [0], [1], [0, 0, 1, 1], [], []>} : vector<2x30xf32>, vector<30x32xf32>, vector<2x32xf32> -> vector<2x32xf32>
    %18 = arith.addf %15, %17 : vector<2x32xf32>
    %c0_19 = arith.constant 0 : index
    %c0_20 = arith.constant 0 : index
    %19 = vector.load %arg8[%c0_19, %c0_20] : memref<1x32xf32, #tpu.memory_space<vmem>>, vector<1x32xf32>
    %20 = vector.broadcast %19 : vector<1x32xf32> to vector<2x32xf32>
    %21 = arith.addf %18, %20 : vector<2x32xf32>
    %22 = tpu.concatenate %21, %21, %21, %21, %21, %21 in 0 : vector<2x32xf32>, vector<2x32xf32>, vector<2x32xf32>, vector<2x32xf32>, vector<2x32xf32>, vector<2x32xf32> -> vector<12x32xf32>
    %c0_21 = arith.constant 0 : index
    %c0_22 = arith.constant 0 : index
    %23 = vector.load %arg7[%c0_21, %c0_22] : memref<30x32xf32, #tpu.memory_space<vmem>>, vector<30x32xf32>
    %cst_23 = arith.constant dense<0.000000e+00> : vector<12x32xf32>
    %24 = tpu.matmul %1, %23, %cst_23 {dimension_numbers = #tpu.dot_dimension_numbers<[1], [0], [0], [1], [0, 0, 1, 1], [], []>} : vector<12x30xf32>, vector<30x32xf32>, vector<12x32xf32> -> vector<12x32xf32>
    %25 = arith.addf %22, %24 : vector<12x32xf32>
    %cst_24 = arith.constant 0.000000e+00 : f32
    %26 = vector.broadcast %cst_24 : f32 to vector<12x32xf32>
    %27 = arith.maximumf %25, %26 : vector<12x32xf32>
    %c0_25 = arith.constant 0 : index
    %c0_26 = arith.constant 0 : index
    %28 = vector.load %arg9[%c0_25, %c0_26] : memref<32x32xf32, #tpu.memory_space<vmem>>, vector<32x32xf32>
    %cst_27 = arith.constant dense<0.000000e+00> : vector<12x32xf32>
    %29 = tpu.matmul %27, %28, %cst_27 {dimension_numbers = #tpu.dot_dimension_numbers<[1], [0], [0], [1], [0, 0, 1, 1], [], []>} : vector<12x32xf32>, vector<32x32xf32>, vector<12x32xf32> -> vector<12x32xf32>
    %c0_28 = arith.constant 0 : index
    %c0_29 = arith.constant 0 : index
    %30 = vector.load %arg10[%c0_28, %c0_29] : memref<1x32xf32, #tpu.memory_space<vmem>>, vector<1x32xf32>
    %31 = vector.broadcast %30 : vector<1x32xf32> to vector<12x32xf32>
    %32 = arith.addf %29, %31 : vector<12x32xf32>
    %cst_30 = arith.constant 0.000000e+00 : f32
    %33 = vector.broadcast %cst_30 : f32 to vector<12x32xf32>
    %34 = arith.maximumf %32, %33 : vector<12x32xf32>
    %c0_31 = arith.constant 0 : index
    %c0_32 = arith.constant 0 : index
    %35 = vector.load %arg11[%c0_31, %c0_32] : memref<32x24xf32, #tpu.memory_space<vmem>>, vector<32x24xf32>
    %cst_33 = arith.constant dense<0.000000e+00> : vector<12x24xf32>
    %36 = tpu.matmul %34, %35, %cst_33 {dimension_numbers = #tpu.dot_dimension_numbers<[1], [0], [0], [1], [0, 0, 1, 1], [], []>} : vector<12x32xf32>, vector<32x24xf32>, vector<12x24xf32> -> vector<12x24xf32>
    %c0_34 = arith.constant 0 : index
    %c0_35 = arith.constant 0 : index
    %37 = vector.load %arg12[%c0_34, %c0_35] : memref<1x24xf32, #tpu.memory_space<vmem>>, vector<1x24xf32>
    %38 = vector.broadcast %37 : vector<1x24xf32> to vector<12x24xf32>
    %39 = arith.addf %36, %38 : vector<12x24xf32>
    %c0_36 = arith.constant 0 : index
    %c0_37 = arith.constant 0 : index
    %40 = vector.load %arg13[%c0_36, %c0_37] : memref<12x24xf32, #tpu.memory_space<vmem>>, vector<12x24xf32>
    tpu.vector_store %arg13[%c0_36, %c0_37], %39 {strides = array<i32>} : memref<12x24xf32, #tpu.memory_space<vmem>>, vector<12x24xf32>,
    return
  }
}

</mosaic_0001>

<bundles_post_ra>
// kernel: differentiable_path_optimizer.3
= control target key start
LH: loop header
LB: loop body
LE: loop exit
PB: predicated region body
PF: predicated region fallthrough
CT: control target
= control target key end

     0   :  { %v806_v0 = vmov 0.0   ;;  %vm807_vm0 = vmmov 0   ;;  %vm58_vm1 = vcmask 261120   ;;  %vm229_vm2 = vcmask 1045504   ;;  %s995_s2 = inlined_call_operand.vmem [shape: f32[32,32], index: 2, kind: input, shape index: {}]   ;;  %s996_s4 = inlined_call_operand.vmem [shape: f32[32,30], index: 4, kind: input, shape index: {}]   ;;  %s997_s0 = inlined_call_operand.vmem [shape: f32[2,32], index: 0, kind: input, shape index: {}]   ;;  %s998_s7 = inlined_call_operand.vmem [shape: f32[30,32], index: 7, kind: input, shape index: {}]   ;;  %s999_s3 = inlined_call_operand.vmem [shape: f32[1,32], index: 3, kind: input, shape index: {}]   ;;  %s1000_s6 = inlined_call_operand.vmem [shape: f32[32,32], index: 6, kind: input, shape index: {}]   ;;  %s1001_s5 = inlined_call_operand.vmem [shape: f32[1,30], index: 5, kind: input, shape index: {}]   ;;  %s1002_s1 = inlined_call_operand.vmem [shape: f32[12,30], index: 1, kind: input, shape index: {}]   ;;  %s1003_s9 = inlined_call_operand.vmem [shape: f32[32,32], index: 9, kind: input, shape index: {}]   ;;  %s1004_s8 = inlined_call_operand.vmem [shape: f32[1,32], index: 8, kind: input, shape index: {}]   ;;  %s1005_s11 = inlined_call_operand.vmem [shape: f32[32,24], index: 11, kind: input, shape index: {}]   ;;  %s1006_s10 = inlined_call_operand.vmem [shape: f32[1,32], index: 10, kind: input, shape index: {}]   ;;  %s1007_s12 = inlined_call_operand.vmem [shape: f32[1,24], index: 12, kind: input, shape index: {}]   ;;  %s1008_s13 = inlined_call_operand.vmem [shape: f32[12,24], index: 13, kind: output, shape index: {}]  }
   0x1   :  { %727 = vmatprep.subr.mxu0 %v806_v0  ;;  %v50_v1 = vld [vmem:[%s995_s2 + $0x18] sm:$0xff]  ;;  %v49_v2 = vld [vmem:[%s995_s2 + $0x10] sm:$0xff]  ;;  %735 = vmatprep.mubr.msk.f32.mxu0 %vm807_vm0, %v806_v0  ;;  %v48_v4 = vld [vmem:[%s995_s2 + $0x8] sm:$0xff]  ;;  %vm225_vm3 = vcmask 244736   ;;  %vm388_vm4 = vcmask 1041408   ;;  %vm390_vm5 = vcmask 1043456  }
   0x2   :  { %728 = vmatpush3.msra.mxu0 %v50_v1  ;;  %738 = vmatprep.subr.mxu1 %v806_v0  ;;  %v136_v3 = vld [vmem:[%s996_s4 + $0x18] sm:$0xff]  ;;  %v47_v5 = vld [vmem:[%s995_s2] sm:$0xff]  ;;  %v135_v7 = vld [vmem:[%s996_s4 + $0x10] sm:$0xff]  ;;  %vm666_vm6 = vcmask 191488   ;;  %vm664_vm7 = vcmask 195584  }
   0x3   :  { %729 = vmatprep.subr.mxu0 %v806_v0  ;;  %739 = vmatpush3.msra.mxu1 %v136_v3  ;;  %v44_v6 = vld [vmem:[%s997_s0] sm:$0x3]  ;;  %v134_v8 = vld [vmem:[%s996_s4 + $0x8] sm:$0xff]  ;;  %v224_v10 = vld [vmem:[%s998_s7 + $0x18] sm:$0x3f] }
   0x4   :  { %730 = vmatpush3.msra.mxu0 %v49_v2  ;;  %740 = vmatprep.subr.mxu1 %v806_v0  ;;  %v133_v9 = vld [vmem:[%s996_s4] sm:$0xff]  ;;  %v223_v11 = vld [vmem:[%s998_s7 + $0x10] sm:$0xff]  ;;  %v222_v12 = vld [vmem:[%s998_s7 + $0x8] sm:$0xff] }
   0x5   :  { %731 = vmatprep.subr.mxu0 %v806_v0  ;;  %746 = vmatprep.mubr.msk.f32.mxu1 %vm807_vm0, %v806_v0  ;;  %v672_v13 = vld [vmem:[%s999_s3] ss:$0 sm:$0xff]  ;;  %v220_v18 = vld [vmem:[%s1000_s6 + $0x18] sm:$0xff]  ;;  %v219_v19 = vld [vmem:[%s1000_s6 + $0x10] sm:$0xff] }
   0x6   :  { %732 = vmatpush3.msra.mxu0 %v48_v4  ;;  %741 = vmatpush3.msra.mxu1 %v135_v7  ;;  %v218_v20 = vld [vmem:[%s1000_s6 + $0x8] sm:$0xff]  ;;  %v217_v21 = vld [vmem:[%s1000_s6] sm:$0xff]  ;;  %v481_v31 = vld [vmem:[%s1003_s9 + $0x18] sm:$0xff] }
   0x7   :  { %733 = vmatprep.subr.mxu0 %v806_v0  ;;  %742 = vmatprep.subr.mxu1 %v806_v0  ;;  %v221_v22 = vld [vmem:[%s998_s7] sm:$0xff]  ;;  %v46_v28 = vld [vmem:[%s1002_s1 + $0x8] sm:$0xf]  ;;  %v480_v32 = vld [vmem:[%s1003_s9 + $0x10] sm:$0xff] }
   0x8   :  { %734 = vmatpush3.msra.mxu0 %v47_v5  ;;  %743 = vmatpush3.msra.mxu1 %v134_v8  ;;  %v674_v23 = vld [vmem:[%s1001_s5] ss:$0 sm:$0xff]  ;;  %v479_v33 = vld [vmem:[%s1003_s9 + $0x8] sm:$0xff]  ;;  %v575_v52 = vld [vmem:[%s1005_s11 + $0x18] sm:$0xff] }
   0x9   :  { %736 = vmatmul.mubr.msk.f32.vlgmr.msra.gmra.mxu0 %vm58_vm1, %v44_v6  ;;  %749 = vmatprep.subr.mxu0 %v806_v0  ;;  %v45_v26 = vld [vmem:[%s1002_s1] sm:$0xff]  ;;  %v574_v53 = vld [vmem:[%s1005_s11 + $0x10] sm:$0xff]  ;;  %v573_v54 = vld [vmem:[%s1005_s11 + $0x8] sm:$0xff] }
   0xa   :  { %757 = vmatprep.mubr.msk.f32.mxu0 %vm807_vm0, %v806_v0  ;;  %744 = vmatprep.subr.mxu1 %v806_v0  ;;  %v478_v34 = vld [vmem:[%s1003_s9] sm:$0xff] }
   0xb   :  { %745 = vmatpush3.msra.mxu1 %v133_v9  ;;  %750 = vmatpush3.msk.msra.mxu0 %vm229_vm2, %v224_v10  ;;  %v679_v36 = vld [vmem:[%s1004_s8] ss:$0 sm:$0xff] }
   0xc   :  { %760 = vmatprep.subr.mxu1 %v806_v0  ;;  %751 = vmatprep.subr.mxu0 %v806_v0  ;;  %v572_v55 = vld [vmem:[%s1005_s11] sm:$0xff] }
   0xd   :  { %752 = vmatpush3.msra.mxu0 %v223_v11  ;;  %v683_v56 = vld [vmem:[%s1006_s10] ss:$0 sm:$0xff] }
   0xe   :  { %753 = vmatprep.subr.mxu0 %v806_v0  ;;  %v686_v63 = vld [vmem:[%s1007_s12] ss:$0 sm:$0xff] }
   0xf   :  { %754 = vmatpush3.msra.mxu0 %v222_v12 }
  0x10   :  { %755 = vmatprep.subr.mxu0 %v806_v0 }
  0x11   :  { %756 = vmatpush3.msra.mxu0 %v221_v22 }
  0x12   :  { %771 = vmatprep.subr.msk.mxu0 %vm229_vm2, %v224_v10 }
  0xc9   :  { %v128_v14 = vpop.f32.mrf.mxu0 }
  0xca   :  { %v129_v15 = vadd.f32 %v672_v13, %v128_v14 }
  0xcb   :  { %v737_v16 = vpop.f32.mrf.mxu0 }
  0xcc   :  { %v132_v17 = vmax.f32 %v129_v15, 0.0 }
  0xce   :  { %747 = vmatmul.mubr.msk.f32.vlgmr.msra.gmra.mxu1 %vm58_vm1, %v132_v17 }
  0xcf   :  { %761 = vmatpush3.msra.mxu1 %v220_v18  ;;  %768 = vmatprep.mubr.msk.f32.mxu1 %vm807_vm0, %v806_v0 }
  0xd0   :  { %762 = vmatprep.subr.mxu1 %v806_v0 }
  0xd1   :  { %763 = vmatpush3.msra.mxu1 %v219_v19 }
  0xd2   :  { %764 = vmatprep.subr.mxu1 %v806_v0 }
  0xd3   :  { %765 = vmatpush3.msra.mxu1 %v218_v20 }
  0xd4   :  { %766 = vmatprep.subr.mxu1 %v806_v0 }
  0xd5   :  { %767 = vmatpush3.msra.mxu1 %v217_v21 }
  0xd6   :  { %769 = vmatmul.mubr.msk.f32.vlgmr.msra.gmra.mxu1 %vm58_vm1, %v44_v6  ;;  %782 = vmatprep.subr.mxu1 %v481_v31 }
  0xd7   :  { %783 = vmatpush3.msra.mxu1 %v481_v31 }
  0xd8   :  { %784 = vmatprep.subr.mxu1 %v480_v32 }
  0xd9   :  { %785 = vmatpush3.msra.mxu1 %v480_v32 }
  0xda   :  { %786 = vmatprep.subr.mxu1 %v479_v33 }
  0xdb   :  { %787 = vmatpush3.msra.mxu1 %v479_v33 }
  0xdc   :  { %788 = vmatprep.subr.mxu1 %v478_v34 }
  0xdd   :  { %789 = vmatpush3.msra.mxu1 %v478_v34 }
 0x18e   :  { %v213_v24 = vpop.f32.mrf.mxu1 }
 0x18f   :  { %v214_v25 = vadd.f32 %v674_v23, %v213_v24 }
 0x190   :  { %v748_v27 = vpop.f32.mrf.mxu1 }
 0x191   :  { %758 = vmatmul.mubr.msk.f32.vlgmr.msra.gmra.mxu0 %vm225_vm3, %v214_v25 }
 0x192   :  { %772 = vmatpush3.msk.msra.mxu0 %vm229_vm2, %v224_v10  ;;  %779 = vmatprep.mubr.msk.f32.mxu0 %vm225_vm3, %v45_v26 }
 0x193   :  { %773 = vmatprep.subr.mxu0 %v223_v11 }
 0x194   :  { %774 = vmatpush3.msra.mxu0 %v223_v11 }
 0x195   :  { %775 = vmatprep.subr.mxu0 %v222_v12 }
 0x196   :  { %776 = vmatpush3.msra.mxu0 %v222_v12  ;;  %v369_v29 = vpop.f32.mrf.mxu1 }
 0x197   :  { %777 = vmatprep.subr.mxu0 %v221_v22 }
 0x198   :  { %778 = vmatpush3.msra.mxu0 %v221_v22  ;;  %v770_v30 = vpop.f32.mrf.mxu1 }
 0x199   :  { %780 = vmatmul.mubr.msk.f32.vlgmr.msra.gmra.mxu0 %vm225_vm3, %v46_v28  ;;  %793 = vmatprep.subr.mxu0 %v575_v52 }
 0x19a   :  { %794 = vmatpush3.msra.mxu0 %v575_v52 }
 0x19b   :  { %795 = vmatprep.subr.mxu0 %v574_v53 }
 0x19c   :  { %796 = vmatpush3.msra.mxu0 %v574_v53 }
 0x19d   :  { %797 = vmatprep.subr.mxu0 %v573_v54 }
 0x19e   :  { %798 = vmatpush3.msra.mxu0 %v573_v54 }
 0x19f   :  { %799 = vmatprep.subr.mxu0 %v572_v55 }
 0x1a0   :  { %800 = vmatpush3.msra.mxu0 %v572_v55 }
 0x251   :  { %v299_v35 = vpop.f32.mrf.mxu0 }
 0x252   :  { %v370_v37 = vadd.f32 %v369_v29, %v299_v35 }
 0x253   :  { %v759_v38 = vpop.f32.mrf.mxu0 }
 0x254   :  { %v380_v39 = vadd.f32 %v679_v36, %v370_v37 }
 0x256   :  { %v382_v40 = vrot.slane %v380_v39, 6  ;;  %v384_v41 = vrot.slane %v380_v39, 4  ;;  %v386_v43 = vrot.slane %v380_v39, 2 }
 0x258   :  { %v389_v42 = vsel %vm388_vm4, %v380_v39, %v382_v40 }
 0x259   :  { %v781_v44 = vpop.f32.mrf.mxu0  ;;  %v391_v45 = vsel %vm390_vm5, %v389_v42, %v384_v41 }
 0x25a   :  { %v392_v46 = vsel %vm229_vm2, %v391_v45, %v386_v43  ;;  %v475_v47 = vadd.f32 %v781_v44, %v389_v42 }
 0x25b   :  { %v465_v48 = vpop.f32.mrf.mxu0 }
 0x25c   :  { %v474_v49 = vadd.f32 %v465_v48, %v392_v46  ;;  %v477_v51 = vmax.f32 %v475_v47, 0.0 }
 0x25e   :  { %v476_v50 = vmax.f32 %v474_v49, 0.0 }
 0x260   :  { %790 = vmatprep.mubr.msk.f32.mxu1 %vm58_vm1, %v476_v50 }
 0x261   :  { %791 = vmatmul.mubr.msk.f32.vlgmr.msra.gmra.mxu1 %vm58_vm1, %v477_v51 }
 0x321   :  { %v792_v57 = vpop.f32.mrf.mxu1 }
 0x322   :  { %v567_v58 = vadd.f32 %v792_v57, %v683_v56 }
 0x323   :  { %v561_v59 = vpop.f32.mrf.mxu1 }
 0x324   :  { %v562_v60 = vadd.f32 %v683_v56, %v561_v59  ;;  %v571_v62 = vmax.f32 %v567_v58, 0.0 }
 0x326   :  { %v570_v61 = vmax.f32 %v562_v60, 0.0 }
 0x328   :  { %801 = vmatprep.mubr.msk.f32.mxu0 %vm58_vm1, %v570_v61 }
 0x329   :  { %802 = vmatmul.mubr.msk.f32.vlgmr.msra.gmra.mxu0 %vm58_vm1, %v571_v62 }
 0x3e9   :  { %v803_v0 = vpop.f32.mrf.mxu0 }
 0x3ea   :  { %v661_v1 = vadd.f32 %v803_v0, %v686_v63 }
 0x3eb   :  { %v655_v2 = vpop.f32.mrf.mxu0 }
 0x3ec   :  { %667 = vst.msk [vmem:[%s1008_s13 + $0x8] sm:$0xf] %vm666_vm6, %v661_v1  ;;  %v656_v3 = vadd.f32 %v686_v63, %v655_v2 }
 0x3ee   :  { %665 = vst.msk [vmem:[%s1008_s13] sm:$0xff] %vm664_vm7, %v656_v3 }

</bundles_post_ra>
